<compile_context>
chip_gen: v7x
topology: tpu7x:2x2x1
jax: 0.10.0
libtpu: 0.0.40
codegen_flags: <defaults>
</compile_context>

<pallas_src>
import functools

import jax
import jax.numpy as jnp
from jax.experimental import pallas as pl
from jax.experimental.pallas import tpu as pltpu


# ---------------------------------------------------------------------------
# Kernel A: stride-1 3x3x3 "same" conv, channel-last, in-kernel tap accumulation
# ---------------------------------------------------------------------------
def _conv3x3_kernel(x0_ref, x1_ref, x2_ref, w_ref, b_ref, o_ref, *, Wp, act):
    # x*_ref : (1, 1, S, Cin)   three consecutive padded depth slabs (flattened H*W)
    # w_ref  : (27, Cin, Cout)  taps ordered kd*9 + kh*3 + kw
    # b_ref  : (1, Cout)
    # o_ref  : (1, 1, RA, Cout) RA = H*Wp rows (rows at w >= W are junk, sliced off)
    RA = o_ref.shape[2]
    Cout = o_ref.shape[3]
    acc = jnp.zeros((RA, Cout), jnp.float32)
    for kd, xr in enumerate((x0_ref, x1_ref, x2_ref)):
        for kh in range(3):
            for kw in range(3):
                off = kh * Wp + kw                               # static offset
                win = xr[0, 0, pl.ds(off, RA), :]                # (RA, Cin)
                acc = acc + jnp.dot(win, w_ref[kd * 9 + kh * 3 + kw, :, :],
                                    preferred_element_type=jnp.float32)
    acc = acc + b_ref[:, :]
    if act:  # LeakyReLU(0.01), PyTorch default slope
        acc = jnp.where(acc >= 0, acc, 0.01 * acc)
    o_ref[0, 0, :, :] = acc.astype(o_ref.dtype)


def conv3d_same(x, w, b, act=False):
    """PyTorch Conv3d(k=3, stride=1, padding='same').  x: (B,D,H,W,Cin) channel-last,
    w: (Cout, Cin, 3, 3, 3), b: (Cout,).  Returns (B,D,H,W,Cout) float32."""
    B, D, H, W, Cin = x.shape
    Cout = w.shape[0]
    Wp = W + 2
    S = (H + 3) * Wp          # slab rows >= H*Wp + 2*Wp + 2 so all tap reads stay in-bounds
    RA = H * Wp               # accumulator rows per output depth slice

    # zero-pad D:(1,1)  H:(1,2)  W:(1,1), flatten (H,W) -> one slab axis
    xp = jnp.pad(x, ((0, 0), (1, 1), (1, 2), (1, 1), (0, 0)))
    xp = xp.reshape(B, D + 2, S, Cin).astype(jnp.float32)
    wt = jnp.transpose(w, (2, 3, 4, 1, 0)).reshape(27, Cin, Cout).astype(jnp.float32)
    b2 = b.reshape(1, Cout).astype(jnp.float32)

    kernel = functools.partial(_conv3x3_kernel, Wp=Wp, act=act)
    out = pl.pallas_call(
        kernel,
        out_shape=jax.ShapeDtypeStruct((B, D, RA, Cout), jnp.float32),
        grid=(B, D),
        in_specs=[
            pl.BlockSpec((1, 1, S, Cin), lambda bb, dd: (bb, dd, 0, 0)),
            pl.BlockSpec((1, 1, S, Cin), lambda bb, dd: (bb, dd + 1, 0, 0)),
            pl.BlockSpec((1, 1, S, Cin), lambda bb, dd: (bb, dd + 2, 0, 0)),
            pl.BlockSpec((27, Cin, Cout), lambda bb, dd: (0, 0, 0)),
            pl.BlockSpec((1, Cout), lambda bb, dd: (0, 0)),
        ],
        out_specs=pl.BlockSpec((1, 1, RA, Cout), lambda bb, dd: (bb, dd, 0, 0)),
        compiler_params=pltpu.CompilerParams(
            dimension_semantics=("parallel", "parallel")),
    )(xp, xp, xp, wt, b2)

    # drop the junk columns (w >= W) introduced by the flat-slab trick
    return out.reshape(B, D, H, Wp, Cout)[:, :, :, :W, :]


# ---------------------------------------------------------------------------
# Kernel B: tap-reduction matmul  (stride-2 convs, 2x deconv)
# ---------------------------------------------------------------------------
def _tap_matmul_kernel(x_ref, w_ref, b_ref, o_ref, acc_ref, *, act):
    t = pl.program_id(1)

    @pl.when(t == 0)
    def _():
        acc_ref[...] = jnp.zeros_like(acc_ref)

    acc_ref[...] += jnp.dot(x_ref[0, :, :], w_ref[0, :, :],
                            preferred_element_type=jnp.float32)

    @pl.when(t == pl.num_programs(1) - 1)
    def _():
        r = acc_ref[...] + b_ref[:, :]
        if act:
            r = jnp.where(r >= 0, r, 0.01 * r)
        o_ref[...] = r.astype(o_ref.dtype)


def _pick_tile(m):
    for t in (512, 256, 128, 64, 32, 16, 8):
        if m % t == 0:
            return t
    return m


def tap_matmul(x, w, b, act=False):
    """x: (T, M, K), w: (T, K, N), b: (N,) -> (M, N) = sum_t x[t] @ w[t] + b."""
    T, M, K = x.shape
    N = w.shape[2]
    TM = _pick_tile(M)
    out = pl.pallas_call(
        functools.partial(_tap_matmul_kernel, act=act),
        out_shape=jax.ShapeDtypeStruct((M, N), jnp.float32),
        grid=(M // TM, T),
        in_specs=[
            pl.BlockSpec((1, TM, K), lambda i, t: (t, i, 0)),
            pl.BlockSpec((1, K, N), lambda i, t: (t, 0, 0)),
            pl.BlockSpec((1, N), lambda i, t: (0, 0)),
        ],
        out_specs=pl.BlockSpec((TM, N), lambda i, t: (i, 0)),
        scratch_shapes=[pltpu.VMEM((TM, N), jnp.float32)],
        compiler_params=pltpu.CompilerParams(
            dimension_semantics=("parallel", "arbitrary")),
    )(x.astype(jnp.float32), w.astype(jnp.float32),
      b.reshape(1, N).astype(jnp.float32))
    return out


def conv3d_down2(x, w, b):
    """PyTorch Conv3d(k=3, stride=2, padding=1) + fused LeakyReLU.
    x: (B,D,H,W,Cin) channel-last, w: (Cout,Cin,3,3,3)."""
    B, D, H, W, Cin = x.shape
    Cout = w.shape[0]
    Do, Ho, Wo = D // 2, H // 2, W // 2
    xp = jnp.pad(x, ((0, 0), (1, 1), (1, 1), (1, 1), (0, 0)))
    taps = []
    for kd in range(3):
        for kh in range(3):
            for kw in range(3):
                taps.append(xp[:, kd:kd + 2 * Do:2, kh:kh + 2 * Ho:2,
                               kw:kw + 2 * Wo:2, :])
    X = jnp.stack(taps, axis=0).reshape(27, B * Do * Ho * Wo, Cin)
    Wt = jnp.transpose(w, (2, 3, 4, 1, 0)).reshape(27, Cin, Cout)
    y = tap_matmul(X, Wt, b, act=True)
    return y.reshape(B, Do, Ho, Wo, Cout)


def deconv3d_2x(x, w, b):
    """PyTorch ConvTranspose3d(k=2, stride=2) + fused LeakyReLU.
    x: (B,D,H,W,Cin) channel-last, w: (Cin, Cout, 2, 2, 2)."""
    B, D, H, W, Cin = x.shape
    Cout = w.shape[1]
    xf = x.reshape(1, B * D * H * W, Cin)
    w2 = jnp.transpose(w, (0, 2, 3, 4, 1)).reshape(1, Cin, 8 * Cout)  # (i,j,k,cout) minor
    b2 = jnp.tile(b, 8)
    y = tap_matmul(xf, w2, b2, act=True)                   # (M, 8*Cout) lane-dense
    y = y.reshape(B, D, H, W, 2, 2, 2, Cout)
    y = jnp.transpose(y, (0, 1, 4, 2, 5, 3, 6, 7))         # channel dim stays minor
    return y.reshape(B, 2 * D, 2 * H, 2 * W, Cout)


# ---------------------------------------------------------------------------
# VecInt (scaling & squaring) and ResizeTransform helpers (plain JAX glue)
# ---------------------------------------------------------------------------
def spatial_transformer(src, flow):
    """voxelmorph SpatialTransformer: trilinear sample of src at (grid + flow),
    align_corners=True, zeros outside.  Channel-last (B,D,H,W,C) / (B,D,H,W,3)."""
    B, D, H, W, C = src.shape
    gd = jnp.arange(D, dtype=jnp.float32).reshape(1, D, 1, 1)
    gh = jnp.arange(H, dtype=jnp.float32).reshape(1, 1, H, 1)
    gw = jnp.arange(W, dtype=jnp.float32).reshape(1, 1, 1, W)
    pd = gd + flow[..., 0]
    ph = gh + flow[..., 1]
    pw = gw + flow[..., 2]
    d0 = jnp.floor(pd); h0 = jnp.floor(ph); w0 = jnp.floor(pw)
    fd = pd - d0; fh = ph - h0; fw = pw - w0
    src_flat = src.reshape(B, D * H * W, C)
    out = jnp.zeros_like(src)
    for dd in (0, 1):
        for hh in (0, 1):
            for ww in (0, 1):
                di = d0 + dd; hi = h0 + hh; wi = w0 + ww
                wt = ((fd if dd else 1.0 - fd)
                      * (fh if hh else 1.0 - fh)
                      * (fw if ww else 1.0 - fw))
                inb = ((di >= 0) & (di <= D - 1) & (hi >= 0) & (hi <= H - 1)
                       & (wi >= 0) & (wi <= W - 1)).astype(jnp.float32)
                dic = jnp.clip(di, 0, D - 1).astype(jnp.int32)
                hic = jnp.clip(hi, 0, H - 1).astype(jnp.int32)
                wic = jnp.clip(wi, 0, W - 1).astype(jnp.int32)
                idx = (dic * H + hic) * W + wic                         # (B, D, H, W)
                idx_b = jnp.broadcast_to(idx.reshape(B, D * H * W, 1), (B, D * H * W, C))
                vals = jnp.take_along_axis(src_flat, idx_b, axis=1).reshape(B, D, H, W, C)
                out = out + (wt * inb)[..., None] * vals
    return out


def vecint(flow, nsteps):
    vec = flow * (1.0 / (2 ** nsteps))
    for _ in range(nsteps):
        vec = vec + spatial_transformer(vec, vec)
    return vec


def _linear_resize_matrix(n_in, n_out):
    if n_in == 1:
        return jnp.ones((n_out, 1), jnp.float32)
    coords = jnp.arange(n_out, dtype=jnp.float32) * (n_in - 1) / (n_out - 1)
    lo = jnp.clip(jnp.floor(coords), 0, n_in - 2).astype(jnp.int32)
    frac = coords - lo.astype(jnp.float32)
    rows = jnp.arange(n_out)
    A = jnp.zeros((n_out, n_in), jnp.float32)
    A = A.at[rows, lo].add(1.0 - frac)
    A = A.at[rows, lo + 1].add(frac)
    return A


def resize_flow_x2(x):
    """ResizeTransform(0.5, ndims=3): multiply by 2, trilinear x2 upsample
    (align_corners=True).  Channel-last flow (B,D,H,W,3)."""
    x = 2.0 * x
    B, D, H, W, C = x.shape
    Ad = _linear_resize_matrix(D, 2 * D)
    Ah = _linear_resize_matrix(H, 2 * H)
    Aw = _linear_resize_matrix(W, 2 * W)
    y = jnp.einsum('pd,bdhwc->bphwc', Ad, x)
    y = jnp.einsum('qh,bphwc->bpqwc', Ah, y)
    y = jnp.einsum('rw,bpqwc->bpqrc', Aw, y)
    return y


# ---------------------------------------------------------------------------
# Parameter initialization (deterministic, synthetic, PyTorch weight layouts)
# ---------------------------------------------------------------------------
def _init_conv(key, cout, cin, k):
    kw, kb = jax.random.split(key)
    return {'w': 0.05 * jax.random.normal(kw, (cout, cin, k, k, k), jnp.float32),
            'b': 0.01 * jax.random.normal(kb, (cout,), jnp.float32)}


def _init_deconv(key, cin, cout, k):
    kw, kb = jax.random.split(key)
    return {'w': 0.05 * jax.random.normal(kw, (cin, cout, k, k, k), jnp.float32),
            'b': 0.01 * jax.random.normal(kb, (cout,), jnp.float32)}


def _init_res_block(key, cin, cout):
    k1, k2, k3 = jax.random.split(key, 3)
    return {'conv1': _init_conv(k1, cout, cin, 3),
            'conv2': _init_conv(k2, cout, cout, 3),
            'add': _init_conv(k3, cout, cin + cout, 3)}


def init_params(key, in_channel=1, n_layers=3, n_channel=32):
    keys = jax.random.split(key, 2 * n_layers)
    enc = [{'res': _init_res_block(keys[0], in_channel * 2, n_channel)}]
    for i in range(1, n_layers):
        kd, kr = jax.random.split(keys[i])
        enc.append({'down': _init_conv(kd, n_channel, n_channel, 3),
                    'res': _init_res_block(kr, n_channel, n_channel)})
    kc, kf = jax.random.split(keys[n_layers])
    dec = [{'conv': _init_conv(kc, n_channel, n_channel, 3),
            'flow': _init_conv(kf, 3, n_channel, 3)}]
    for i in range(1, n_layers):
        kdc, kc, kf = jax.random.split(keys[n_layers + i], 3)
        dec.append({'deconv': _init_deconv(kdc, n_channel, n_channel, 2),
                    'conv': _init_conv(kc, n_channel, n_channel * 2, 3),
                    'flow': _init_conv(kf, 3, n_channel, 3)})
    return {'enc': enc, 'dec': dec}


# ---------------------------------------------------------------------------
# Forward pass (mirrors the PyTorch module structure; channel-last internally)
# ---------------------------------------------------------------------------
def residual_block_fwd(p, x_in):
    x = conv3d_same(x_in, p['conv1']['w'], p['conv1']['b'], act=True)
    x = conv3d_same(x, p['conv2']['w'], p['conv2']['b'], act=False)
    x = conv3d_same(jnp.concatenate([x_in, x], axis=-1),
                    p['add']['w'], p['add']['b'], act=True)
    return x


def encoder_fwd(enc_params, x):
    xs = []
    for i, p in enumerate(enc_params):
        if i > 0:
            x = conv3d_down2(x, p['down']['w'], p['down']['b'])   # leaky fused
        x = residual_block_fwd(p['res'], x)
        xs.append(x)
    return x, xs


def dec_layer_fwd(p, x, x_enc, int_steps):
    if 'deconv' in p:
        x = deconv3d_2x(x, p['deconv']['w'], p['deconv']['b'])    # leaky fused
    if x_enc is not None:
        x = jnp.concatenate([x, x_enc], axis=-1)
    x = conv3d_same(x, p['conv']['w'], p['conv']['b'], act=False)
    flow_pos = conv3d_same(x, p['flow']['w'], p['flow']['b'], act=False)
    flow_neg = -flow_pos
    if int_steps > 0:
        flow_pos = vecint(flow_pos, int_steps)
        flow_neg = vecint(flow_neg, int_steps)
    return x, flow_pos, flow_neg


def decoder_fwd(dec_params, x, xs_enc, int_steps):
    n_layers = len(dec_params)
    x, dp, dn = dec_layer_fwd(dec_params[0], x, None, int_steps)
    disps_res = [[dp, dn]]
    disps = [disps_res[0]]
    for i in range(1, n_layers):
        x, dp, dn = dec_layer_fwd(dec_params[i], x, xs_enc[-i - 1], int_steps)
        disp_pos = resize_flow_x2(disps[-1][0]) + dp
        disp_neg = resize_flow_x2(disps[-1][1]) + dn
        disps_res.append([dp, dn])
        disps.append([disp_pos, disp_neg])
    return disps, disps_res


def mrreg_forward(params, source, target, int_steps=1):
    # inputs are PyTorch-style NCDHW; convert once to channel-last
    s = jnp.transpose(source, (0, 2, 3, 4, 1))
    t = jnp.transpose(target, (0, 2, 3, 4, 1))
    x = jnp.concatenate([s, t], axis=-1)
    x, xs_enc = encoder_fwd(params['enc'], x)
    disps, disps_res = decoder_fwd(params['dec'], x, xs_enc, int_steps)
    to_ncdhw = lambda a: jnp.transpose(a, (0, 4, 1, 2, 3))
    disps = [[to_ncdhw(d) for d in pair] for pair in disps]
    disps_res = [[to_ncdhw(d) for d in pair] for pair in disps_res]
    return disps, disps_res


# ---------------------------------------------------------------------------
# Plain-jnp references for the two Pallas kernels (self-check only)
# ---------------------------------------------------------------------------
def _conv3d_same_ref(x, w, b, act):
    B, D, H, W, Cin = x.shape
    Cout = w.shape[0]
    xp = jnp.pad(x, ((0, 0), (1, 1), (1, 1), (1, 1), (0, 0)))
    out = jnp.zeros((B, D, H, W, Cout), jnp.float32) + b.reshape(1, 1, 1, 1, Cout)
    for kd in range(3):
        for kh in range(3):
            for kw in range(3):
                win = xp[:, kd:kd + D, kh:kh + H, kw:kw + W, :]
                out = out + jnp.einsum('bdhwc,cf->bdhwf', win,
                                       jnp.transpose(w[:, :, kd, kh, kw]))
    if act:
        out = jnp.where(out >= 0, out, 0.01 * out)
    return out


def _conv3d_down2_ref(x, w, b):
    B, D, H, W, Cin = x.shape
    Cout = w.shape[0]
    Do, Ho, Wo = D // 2, H // 2, W // 2
    xp = jnp.pad(x, ((0, 0), (1, 1), (1, 1), (1, 1), (0, 0)))
    out = jnp.zeros((B, Do, Ho, Wo, Cout), jnp.float32) + b.reshape(1, 1, 1, 1, Cout)
    for kd in range(3):
        for kh in range(3):
            for kw in range(3):
                win = xp[:, kd:kd + 2 * Do:2, kh:kh + 2 * Ho:2, kw:kw + 2 * Wo:2, :]
                out = out + jnp.einsum('bdhwc,cf->bdhwf', win,
                                       jnp.transpose(w[:, :, kd, kh, kw]))
    return jnp.where(out >= 0, out, 0.01 * out)


# ---------------------------------------------------------------------------
if __name__ == "__main__":
    # --- tiny numerical self-checks of the Pallas kernels ---
    ck = jax.random.PRNGKey(1)
    kx, kw1, kb1, kw2, kb2 = jax.random.split(ck, 5)
    x_chk = jax.random.normal(kx, (1, 3, 4, 6, 2), jnp.float32)
    w_chk = 0.1 * jax.random.normal(kw1, (3, 2, 3, 3, 3), jnp.float32)
    b_chk = 0.1 * jax.random.normal(kb1, (3,), jnp.float32)
    err1 = float(jnp.max(jnp.abs(conv3d_same(x_chk, w_chk, b_chk, act=True)
                                 - _conv3d_same_ref(x_chk, w_chk, b_chk, act=True))))
    assert err1 < 1e-3, f"conv3d_same self-check failed, max|diff|={err1}"

    x_chk2 = jax.random.normal(kx, (1, 4, 4, 4, 2), jnp.float32)
    w_chk2 = 0.1 * jax.random.normal(kw2, (3, 2, 3, 3, 3), jnp.float32)
    b_chk2 = 0.1 * jax.random.normal(kb2, (3,), jnp.float32)
    err2 = float(jnp.max(jnp.abs(conv3d_down2(x_chk2, w_chk2, b_chk2)
                                 - _conv3d_down2_ref(x_chk2, w_chk2, b_chk2))))
    assert err2 < 1e-3, f"conv3d_down2 self-check failed, max|diff|={err2}"

    # --- full MrReg forward ---
    key = jax.random.PRNGKey(0)
    kp, ks, kt = jax.random.split(key, 3)

    n_layers = 3          # MrReg(in_channel=1, n_layers=3, int_steps=1), n_channel=32
    int_steps = 1
    B, D, H, W = 1, 16, 16, 16

    params = init_params(kp, in_channel=1, n_layers=n_layers, n_channel=32)
    source = jax.random.normal(ks, (B, 1, D, H, W), jnp.float32)
    target = jax.random.normal(kt, (B, 1, D, H, W), jnp.float32)

    fwd = jax.jit(functools.partial(mrreg_forward, int_steps=int_steps))
    disps, disps_res = fwd(params, source, target)
    jax.block_until_ready((disps, disps_res))
    print("KERNEL_OK")
</pallas_src>

<mosaic_0001>
module attributes {stable_mosaic.version = 11 : i64} {
  func.func @_conv3x3_kernel(%arg0: i32, %arg1: i32, %arg2: memref<1x1x56x2xf32, #tpu.memory_space<vmem>>, %arg3: memref<1x1x56x2xf32, #tpu.memory_space<vmem>>, %arg4: memref<1x1x56x2xf32, #tpu.memory_space<vmem>>, %arg5: memref<27x2x3xf32, #tpu.memory_space<vmem>>, %arg6: memref<1x3xf32, #tpu.memory_space<vmem>>, %arg7: memref<1x1x32x3xf32, #tpu.memory_space<vmem>>) attributes {dimension_semantics = [#tpu.dimension_semantics<parallel>, #tpu.dimension_semantics<parallel>], iteration_bounds = array<i64: 1, 3>, scalar_prefetch = 0 : i64, scratch_operands = 0 : i64, tpu.core_type = #tpu.core_type<tc>, window_params = [{transform_indices = @transform_0, window_bounds = array<i64: 1, 1, 56, 2>}, {transform_indices = @transform_1, window_bounds = array<i64: 1, 1, 56, 2>}, {transform_indices = @transform_2, window_bounds = array<i64: 1, 1, 56, 2>}, {pipeline_mode = #tpu.pipeline_mode<synchronous>, transform_indices = @transform_3, window_bounds = array<i64: 27, 2, 3>}, {pipeline_mode = #tpu.pipeline_mode<synchronous>, transform_indices = @transform_4, window_bounds = array<i64: 1, 3>}, {transform_indices = @transform_5, window_bounds = array<i64: 1, 1, 32, 3>}]} {
    %cst = arith.constant 0.000000e+00 : f32
    %0 = vector.broadcast %cst : f32 to vector<32x3xf32>
    %c0 = arith.constant 0 : index
    %c0_0 = arith.constant 0 : index
    %c0_1 = arith.constant 0 : index
    %c0_2 = arith.constant 0 : index
    %1 = vector.load %arg2[%c0, %c0_0, %c0_1, %c0_2] : memref<1x1x56x2xf32, #tpu.memory_space<vmem>>, vector<1x1x32x2xf32>
    %2 = vector.shape_cast %1 : vector<1x1x32x2xf32> to vector<32x2xf32>
    %c0_3 = arith.constant 0 : index
    %c0_4 = arith.constant 0 : index
    %c0_5 = arith.constant 0 : index
    %3 = vector.load %arg5[%c0_3, %c0_4, %c0_5] : memref<27x2x3xf32, #tpu.memory_space<vmem>>, vector<1x2x3xf32>
    %4 = vector.shape_cast %3 : vector<1x2x3xf32> to vector<2x3xf32>
    %cst_6 = arith.constant dense<0.000000e+00> : vector<32x3xf32>
    %5 = tpu.matmul %2, %4, %cst_6 {dimension_numbers = #tpu.dot_dimension_numbers<[1], [0], [0], [1], [0, 0, 1, 1], [], []>} : vector<32x2xf32>, vector<2x3xf32>, vector<32x3xf32> -> vector<32x3xf32>
    %6 = arith.addf %0, %5 : vector<32x3xf32>
    %c0_7 = arith.constant 0 : index
    %c0_8 = arith.constant 0 : index
    %c1 = arith.constant 1 : index
    %c0_9 = arith.constant 0 : index
    %7 = vector.load %arg2[%c0_7, %c0_8, %c1, %c0_9] : memref<1x1x56x2xf32, #tpu.memory_space<vmem>>, vector<1x1x32x2xf32>
    %8 = vector.shape_cast %7 : vector<1x1x32x2xf32> to vector<32x2xf32>
    %c1_10 = arith.constant 1 : index
    %c0_11 = arith.constant 0 : index
    %c0_12 = arith.constant 0 : index
    %9 = vector.load %arg5[%c1_10, %c0_11, %c0_12] : memref<27x2x3xf32, #tpu.memory_space<vmem>>, vector<1x2x3xf32>
    %10 = vector.shape_cast %9 : vector<1x2x3xf32> to vector<2x3xf32>
    %cst_13 = arith.constant dense<0.000000e+00> : vector<32x3xf32>
    %11 = tpu.matmul %8, %10, %cst_13 {dimension_numbers = #tpu.dot_dimension_numbers<[1], [0], [0], [1], [0, 0, 1, 1], [], []>} : vector<32x2xf32>, vector<2x3xf32>, vector<32x3xf32> -> vector<32x3xf32>
    %12 = arith.addf %6, %11 : vector<32x3xf32>
    %c0_14 = arith.constant 0 : index
    %c0_15 = arith.constant 0 : index
    %c2 = arith.constant 2 : index
    %c0_16 = arith.constant 0 : index
    %13 = vector.load %arg2[%c0_14, %c0_15, %c2, %c0_16] : memref<1x1x56x2xf32, #tpu.memory_space<vmem>>, vector<1x1x32x2xf32>
    %14 = vector.shape_cast %13 : vector<1x1x32x2xf32> to vector<32x2xf32>
    %c2_17 = arith.constant 2 : index
    %c0_18 = arith.constant 0 : index
    %c0_19 = arith.constant 0 : index
    %15 = vector.load %arg5[%c2_17, %c0_18, %c0_19] : memref<27x2x3xf32, #tpu.memory_space<vmem>>, vector<1x2x3xf32>
    %16 = vector.shape_cast %15 : vector<1x2x3xf32> to vector<2x3xf32>
    %cst_20 = arith.constant dense<0.000000e+00> : vector<32x3xf32>
    %17 = tpu.matmul %14, %16, %cst_20 {dimension_numbers = #tpu.dot_dimension_numbers<[1], [0], [0], [1], [0, 0, 1, 1], [], []>} : vector<32x2xf32>, vector<2x3xf32>, vector<32x3xf32> -> vector<32x3xf32>
    %18 = arith.addf %12, %17 : vector<32x3xf32>
    %c0_21 = arith.constant 0 : index
    %c0_22 = arith.constant 0 : index
    %c8 = arith.constant 8 : index
    %c0_23 = arith.constant 0 : index
    %19 = vector.load %arg2[%c0_21, %c0_22, %c8, %c0_23] : memref<1x1x56x2xf32, #tpu.memory_space<vmem>>, vector<1x1x32x2xf32>
    %20 = vector.shape_cast %19 : vector<1x1x32x2xf32> to vector<32x2xf32>
    %c3 = arith.constant 3 : index
    %c0_24 = arith.constant 0 : index
    %c0_25 = arith.constant 0 : index
    %21 = vector.load %arg5[%c3, %c0_24, %c0_25] : memref<27x2x3xf32, #tpu.memory_space<vmem>>, vector<1x2x3xf32>
    %22 = vector.shape_cast %21 : vector<1x2x3xf32> to vector<2x3xf32>
    %cst_26 = arith.constant dense<0.000000e+00> : vector<32x3xf32>
    %23 = tpu.matmul %20, %22, %cst_26 {dimension_numbers = #tpu.dot_dimension_numbers<[1], [0], [0], [1], [0, 0, 1, 1], [], []>} : vector<32x2xf32>, vector<2x3xf32>, vector<32x3xf32> -> vector<32x3xf32>
    %24 = arith.addf %18, %23 : vector<32x3xf32>
    %c0_27 = arith.constant 0 : index
    %c0_28 = arith.constant 0 : index
    %c9 = arith.constant 9 : index
    %c0_29 = arith.constant 0 : index
    %25 = vector.load %arg2[%c0_27, %c0_28, %c9, %c0_29] : memref<1x1x56x2xf32, #tpu.memory_space<vmem>>, vector<1x1x32x2xf32>
    %26 = vector.shape_cast %25 : vector<1x1x32x2xf32> to vector<32x2xf32>
    %c4 = arith.constant 4 : index
    %c0_30 = arith.constant 0 : index
    %c0_31 = arith.constant 0 : index
    %27 = vector.load %arg5[%c4, %c0_30, %c0_31] : memref<27x2x3xf32, #tpu.memory_space<vmem>>, vector<1x2x3xf32>
    %28 = vector.shape_cast %27 : vector<1x2x3xf32> to vector<2x3xf32>
    %cst_32 = arith.constant dense<0.000000e+00> : vector<32x3xf32>
    %29 = tpu.matmul %26, %28, %cst_32 {dimension_numbers = #tpu.dot_dimension_numbers<[1], [0], [0], [1], [0, 0, 1, 1], [], []>} : vector<32x2xf32>, vector<2x3xf32>, vector<32x3xf32> -> vector<32x3xf32>
    %30 = arith.addf %24, %29 : vector<32x3xf32>
    %c0_33 = arith.constant 0 : index
    %c0_34 = arith.constant 0 : index
    %c10 = arith.constant 10 : index
    %c0_35 = arith.constant 0 : index
    %31 = vector.load %arg2[%c0_33, %c0_34, %c10, %c0_35] : memref<1x1x56x2xf32, #tpu.memory_space<vmem>>, vector<1x1x32x2xf32>
    %32 = vector.shape_cast %31 : vector<1x1x32x2xf32> to vector<32x2xf32>
    %c5 = arith.constant 5 : index
    %c0_36 = arith.constant 0 : index
    %c0_37 = arith.constant 0 : index
    %33 = vector.load %arg5[%c5, %c0_36, %c0_37] : memref<27x2x3xf32, #tpu.memory_space<vmem>>, vector<1x2x3xf32>
    %34 = vector.shape_cast %33 : vector<1x2x3xf32> to vector<2x3xf32>
    %cst_38 = arith.constant dense<0.000000e+00> : vector<32x3xf32>
    %35 = tpu.matmul %32, %34, %cst_38 {dimension_numbers = #tpu.dot_dimension_numbers<[1], [0], [0], [1], [0, 0, 1, 1], [], []>} : vector<32x2xf32>, vector<2x3xf32>, vector<32x3xf32> -> vector<32x3xf32>
    %36 = arith.addf %30, %35 : vector<32x3xf32>
    %c0_39 = arith.constant 0 : index
    %c0_40 = arith.constant 0 : index
    %c16 = arith.constant 16 : index
    %c0_41 = arith.constant 0 : index
    %37 = vector.load %arg2[%c0_39, %c0_40, %c16, %c0_41] : memref<1x1x56x2xf32, #tpu.memory_space<vmem>>, vector<1x1x32x2xf32>
    %38 = vector.shape_cast %37 : vector<1x1x32x2xf32> to vector<32x2xf32>
    %c6 = arith.constant 6 : index
    %c0_42 = arith.constant 0 : index
    %c0_43 = arith.constant 0 : index
    %39 = vector.load %arg5[%c6, %c0_42, %c0_43] : memref<27x2x3xf32, #tpu.memory_space<vmem>>, vector<1x2x3xf32>
    %40 = vector.shape_cast %39 : vector<1x2x3xf32> to vector<2x3xf32>
    %cst_44 = arith.constant dense<0.000000e+00> : vector<32x3xf32>
    %41 = tpu.matmul %38, %40, %cst_44 {dimension_numbers = #tpu.dot_dimension_numbers<[1], [0], [0], [1], [0, 0, 1, 1], [], []>} : vector<32x2xf32>, vector<2x3xf32>, vector<32x3xf32> -> vector<32x3xf32>
    %42 = arith.addf %36, %41 : vector<32x3xf32>
    %c0_45 = arith.constant 0 : index
    %c0_46 = arith.constant 0 : index
    %c17 = arith.constant 17 : index
    %c0_47 = arith.constant 0 : index
    %43 = vector.load %arg2[%c0_45, %c0_46, %c17, %c0_47] : memref<1x1x56x2xf32, #tpu.memory_space<vmem>>, vector<1x1x32x2xf32>
    %44 = vector.shape_cast %43 : vector<1x1x32x2xf32> to vector<32x2xf32>
    %c7 = arith.constant 7 : index
    %c0_48 = arith.constant 0 : index
    %c0_49 = arith.constant 0 : index
    %45 = vector.load %arg5[%c7, %c0_48, %c0_49] : memref<27x2x3xf32, #tpu.memory_space<vmem>>, vector<1x2x3xf32>
    %46 = vector.shape_cast %45 : vector<1x2x3xf32> to vector<2x3xf32>
    %cst_50 = arith.constant dense<0.000000e+00> : vector<32x3xf32>
    %47 = tpu.matmul %44, %46, %cst_50 {dimension_numbers = #tpu.dot_dimension_numbers<[1], [0], [0], [1], [0, 0, 1, 1], [], []>} : vector<32x2xf32>, vector<2x3xf32>, vector<32x3xf32> -> vector<32x3xf32>
    %48 = arith.addf %42, %47 : vector<32x3xf32>
    %c0_51 = arith.constant 0 : index
    %c0_52 = arith.constant 0 : index
    %c18 = arith.constant 18 : index
    %c0_53 = arith.constant 0 : index
    %49 = vector.load %arg2[%c0_51, %c0_52, %c18, %c0_53] : memref<1x1x56x2xf32, #tpu.memory_space<vmem>>, vector<1x1x32x2xf32>
    %50 = vector.shape_cast %49 : vector<1x1x32x2xf32> to vector<32x2xf32>
    %c8_54 = arith.constant 8 : index
    %c0_55 = arith.constant 0 : index
    %c0_56 = arith.constant 0 : index
    %51 = vector.load %arg5[%c8_54, %c0_55, %c0_56] : memref<27x2x3xf32, #tpu.memory_space<vmem>>, vector<1x2x3xf32>
    %52 = vector.shape_cast %51 : vector<1x2x3xf32> to vector<2x3xf32>
    %cst_57 = arith.constant dense<0.000000e+00> : vector<32x3xf32>
    %53 = tpu.matmul %50, %52, %cst_57 {dimension_numbers = #tpu.dot_dimension_numbers<[1], [0], [0], [1], [0, 0, 1, 1], [], []>} : vector<32x2xf32>, vector<2x3xf32>, vector<32x3xf32> -> vector<32x3xf32>
    %54 = arith.addf %48, %53 : vector<32x3xf32>
    %c0_58 = arith.constant 0 : index
    %c0_59 = arith.constant 0 : index
    %c0_60 = arith.constant 0 : index
    %c0_61 = arith.constant 0 : index
    %55 = vector.load %arg3[%c0_58, %c0_59, %c0_60, %c0_61] : memref<1x1x56x2xf32, #tpu.memory_space<vmem>>, vector<1x1x32x2xf32>
    %56 = vector.shape_cast %55 : vector<1x1x32x2xf32> to vector<32x2xf32>
    %c9_62 = arith.constant 9 : index
    %c0_63 = arith.constant 0 : index
    %c0_64 = arith.constant 0 : index
    %57 = vector.load %arg5[%c9_62, %c0_63, %c0_64] : memref<27x2x3xf32, #tpu.memory_space<vmem>>, vector<1x2x3xf32>
    %58 = vector.shape_cast %57 : vector<1x2x3xf32> to vector<2x3xf32>
    %cst_65 = arith.constant dense<0.000000e+00> : vector<32x3xf32>
    %59 = tpu.matmul %56, %58, %cst_65 {dimension_numbers = #tpu.dot_dimension_numbers<[1], [0], [0], [1], [0, 0, 1, 1], [], []>} : vector<32x2xf32>, vector<2x3xf32>, vector<32x3xf32> -> vector<32x3xf32>
    %60 = arith.addf %54, %59 : vector<32x3xf32>
    %c0_66 = arith.constant 0 : index
    %c0_67 = arith.constant 0 : index
    %c1_68 = arith.constant 1 : index
    %c0_69 = arith.constant 0 : index
    %61 = vector.load %arg3[%c0_66, %c0_67, %c1_68, %c0_69] : memref<1x1x56x2xf32, #tpu.memory_space<vmem>>, vector<1x1x32x2xf32>
    %62 = vector.shape_cast %61 : vector<1x1x32x2xf32> to vector<32x2xf32>
    %c10_70 = arith.constant 10 : index
    %c0_71 = arith.constant 0 : index
    %c0_72 = arith.constant 0 : index
    %63 = vector.load %arg5[%c10_70, %c0_71, %c0_72] : memref<27x2x3xf32, #tpu.memory_space<vmem>>, vector<1x2x3xf32>
    %64 = vector.shape_cast %63 : vector<1x2x3xf32> to vector<2x3xf32>
    %cst_73 = arith.constant dense<0.000000e+00> : vector<32x3xf32>
    %65 = tpu.matmul %62, %64, %cst_73 {dimension_numbers = #tpu.dot_dimension_numbers<[1], [0], [0], [1], [0, 0, 1, 1], [], []>} : vector<32x2xf32>, vector<2x3xf32>, vector<32x3xf32> -> vector<32x3xf32>
    %66 = arith.addf %60, %65 : vector<32x3xf32>
    %c0_74 = arith.constant 0 : index
    %c0_75 = arith.constant 0 : index
    %c2_76 = arith.constant 2 : index
    %c0_77 = arith.constant 0 : index
    %67 = vector.load %arg3[%c0_74, %c0_75, %c2_76, %c0_77] : memref<1x1x56x2xf32, #tpu.memory_space<vmem>>, vector<1x1x32x2xf32>
    %68 = vector.shape_cast %67 : vector<1x1x32x2xf32> to vector<32x2xf32>
    %c11 = arith.constant 11 : index
    %c0_78 = arith.constant 0 : index
    %c0_79 = arith.constant 0 : index
    %69 = vector.load %arg5[%c11, %c0_78, %c0_79] : memref<27x2x3xf32, #tpu.memory_space<vmem>>, vector<1x2x3xf32>
    %70 = vector.shape_cast %69 : vector<1x2x3xf32> to vector<2x3xf32>
    %cst_80 = arith.constant dense<0.000000e+00> : vector<32x3xf32>
    %71 = tpu.matmul %68, %70, %cst_80 {dimension_numbers = #tpu.dot_dimension_numbers<[1], [0], [0], [1], [0, 0, 1, 1], [], []>} : vector<32x2xf32>, vector<2x3xf32>, vector<32x3xf32> -> vector<32x3xf32>
    %72 = arith.addf %66, %71 : vector<32x3xf32>
    %c0_81 = arith.constant 0 : index
    %c0_82 = arith.constant 0 : index
    %c8_83 = arith.constant 8 : index
    %c0_84 = arith.constant 0 : index
    %73 = vector.load %arg3[%c0_81, %c0_82, %c8_83, %c0_84] : memref<1x1x56x2xf32, #tpu.memory_space<vmem>>, vector<1x1x32x2xf32>
    %74 = vector.shape_cast %73 : vector<1x1x32x2xf32> to vector<32x2xf32>
    %c12 = arith.constant 12 : index
    %c0_85 = arith.constant 0 : index
    %c0_86 = arith.constant 0 : index
    %75 = vector.load %arg5[%c12, %c0_85, %c0_86] : memref<27x2x3xf32, #tpu.memory_space<vmem>>, vector<1x2x3xf32>
    %76 = vector.shape_cast %75 : vector<1x2x3xf32> to vector<2x3xf32>
    %cst_87 = arith.constant dense<0.000000e+00> : vector<32x3xf32>
    %77 = tpu.matmul %74, %76, %cst_87 {dimension_numbers = #tpu.dot_dimension_numbers<[1], [0], [0], [1], [0, 0, 1, 1], [], []>} : vector<32x2xf32>, vector<2x3xf32>, vector<32x3xf32> -> vector<32x3xf32>
    %78 = arith.addf %72, %77 : vector<32x3xf32>
    %c0_88 = arith.constant 0 : index
    %c0_89 = arith.constant 0 : index
    %c9_90 = arith.constant 9 : index
    %c0_91 = arith.constant 0 : index
    %79 = vector.load %arg3[%c0_88, %c0_89, %c9_90, %c0_91] : memref<1x1x56x2xf32, #tpu.memory_space<vmem>>, vector<1x1x32x2xf32>
    %80 = vector.shape_cast %79 : vector<1x1x32x2xf32> to vector<32x2xf32>
    %c13 = arith.constant 13 : index
    %c0_92 = arith.constant 0 : index
    %c0_93 = arith.constant 0 : index
    %81 = vector.load %arg5[%c13, %c0_92, %c0_93] : memref<27x2x3xf32, #tpu.memory_space<vmem>>, vector<1x2x3xf32>
    %82 = vector.shape_cast %81 : vector<1x2x3xf32> to vector<2x3xf32>
    %cst_94 = arith.constant dense<0.000000e+00> : vector<32x3xf32>
    %83 = tpu.matmul %80, %82, %cst_94 {dimension_numbers = #tpu.dot_dimension_numbers<[1], [0], [0], [1], [0, 0, 1, 1], [], []>} : vector<32x2xf32>, vector<2x3xf32>, vector<32x3xf32> -> vector<32x3xf32>
    %84 = arith.addf %78, %83 : vector<32x3xf32>
    %c0_95 = arith.constant 0 : index
    %c0_96 = arith.constant 0 : index
    %c10_97 = arith.constant 10 : index
    %c0_98 = arith.constant 0 : index
    %85 = vector.load %arg3[%c0_95, %c0_96, %c10_97, %c0_98] : memref<1x1x56x2xf32, #tpu.memory_space<vmem>>, vector<1x1x32x2xf32>
    %86 = vector.shape_cast %85 : vector<1x1x32x2xf32> to vector<32x2xf32>
    %c14 = arith.constant 14 : index
    %c0_99 = arith.constant 0 : index
    %c0_100 = arith.constant 0 : index
    %87 = vector.load %arg5[%c14, %c0_99, %c0_100] : memref<27x2x3xf32, #tpu.memory_space<vmem>>, vector<1x2x3xf32>
    %88 = vector.shape_cast %87 : vector<1x2x3xf32> to vector<2x3xf32>
    %cst_101 = arith.constant dense<0.000000e+00> : vector<32x3xf32>
    %89 = tpu.matmul %86, %88, %cst_101 {dimension_numbers = #tpu.dot_dimension_numbers<[1], [0], [0], [1], [0, 0, 1, 1], [], []>} : vector<32x2xf32>, vector<2x3xf32>, vector<32x3xf32> -> vector<32x3xf32>
    %90 = arith.addf %84, %89 : vector<32x3xf32>
    %c0_102 = arith.constant 0 : index
    %c0_103 = arith.constant 0 : index
    %c16_104 = arith.constant 16 : index
    %c0_105 = arith.constant 0 : index
    %91 = vector.load %arg3[%c0_102, %c0_103, %c16_104, %c0_105] : memref<1x1x56x2xf32, #tpu.memory_space<vmem>>, vector<1x1x32x2xf32>
    %92 = vector.shape_cast %91 : vector<1x1x32x2xf32> to vector<32x2xf32>
    %c15 = arith.constant 15 : index
    %c0_106 = arith.constant 0 : index
    %c0_107 = arith.constant 0 : index
    %93 = vector.load %arg5[%c15, %c0_106, %c0_107] : memref<27x2x3xf32, #tpu.memory_space<vmem>>, vector<1x2x3xf32>
    %94 = vector.shape_cast %93 : vector<1x2x3xf32> to vector<2x3xf32>
    %cst_108 = arith.constant dense<0.000000e+00> : vector<32x3xf32>
    %95 = tpu.matmul %92, %94, %cst_108 {dimension_numbers = #tpu.dot_dimension_numbers<[1], [0], [0], [1], [0, 0, 1, 1], [], []>} : vector<32x2xf32>, vector<2x3xf32>, vector<32x3xf32> -> vector<32x3xf32>
    %96 = arith.addf %90, %95 : vector<32x3xf32>
    %c0_109 = arith.constant 0 : index
    %c0_110 = arith.constant 0 : index
    %c17_111 = arith.constant 17 : index
    %c0_112 = arith.constant 0 : index
    %97 = vector.load %arg3[%c0_109, %c0_110, %c17_111, %c0_112] : memref<1x1x56x2xf32, #tpu.memory_space<vmem>>, vector<1x1x32x2xf32>
    %98 = vector.shape_cast %97 : vector<1x1x32x2xf32> to vector<32x2xf32>
    %c16_113 = arith.constant 16 : index
    %c0_114 = arith.constant 0 : index
    %c0_115 = arith.constant 0 : index
    %99 = vector.load %arg5[%c16_113, %c0_114, %c0_115] : memref<27x2x3xf32, #tpu.memory_space<vmem>>, vector<1x2x3xf32>
    %100 = vector.shape_cast %99 : vector<1x2x3xf32> to vector<2x3xf32>
    %cst_116 = arith.constant dense<0.000000e+00> : vector<32x3xf32>
    %101 = tpu.matmul %98, %100, %cst_116 {dimension_numbers = #tpu.dot_dimension_numbers<[1], [0], [0], [1], [0, 0, 1, 1], [], []>} : vector<32x2xf32>, vector<2x3xf32>, vector<32x3xf32> -> vector<32x3xf32>
    %102 = arith.addf %96, %101 : vector<32x3xf32>
    %c0_117 = arith.constant 0 : index
    %c0_118 = arith.constant 0 : index
    %c18_119 = arith.constant 18 : index
    %c0_120 = arith.constant 0 : index
    %103 = vector.load %arg3[%c0_117, %c0_118, %c18_119, %c0_120] : memref<1x1x56x2xf32, #tpu.memory_space<vmem>>, vector<1x1x32x2xf32>
    %104 = vector.shape_cast %103 : vector<1x1x32x2xf32> to vector<32x2xf32>
    %c17_121 = arith.constant 17 : index
    %c0_122 = arith.constant 0 : index
    %c0_123 = arith.constant 0 : index
    %105 = vector.load %arg5[%c17_121, %c0_122, %c0_123] : memref<27x2x3xf32, #tpu.memory_space<vmem>>, vector<1x2x3xf32>
    %106 = vector.shape_cast %105 : vector<1x2x3xf32> to vector<2x3xf32>
    %cst_124 = arith.constant dense<0.000000e+00> : vector<32x3xf32>
    %107 = tpu.matmul %104, %106, %cst_124 {dimension_numbers = #tpu.dot_dimension_numbers<[1], [0], [0], [1], [0, 0, 1, 1], [], []>} : vector<32x2xf32>, vector<2x3xf32>, vector<32x3xf32> -> vector<32x3xf32>
    %108 = arith.addf %102, %107 : vector<32x3xf32>
    %c0_125 = arith.constant 0 : index
    %c0_126 = arith.constant 0 : index
    %c0_127 = arith.constant 0 : index
    %c0_128 = arith.constant 0 : index
    %109 = vector.load %arg4[%c0_125, %c0_126, %c0_127, %c0_128] : memref<1x1x56x2xf32, #tpu.memory_space<vmem>>, vector<1x1x32x2xf32>
    %110 = vector.shape_cast %109 : vector<1x1x32x2xf32> to vector<32x2xf32>
    %c18_129 = arith.constant 18 : index
    %c0_130 = arith.constant 0 : index
    %c0_131 = arith.constant 0 : index
    %111 = vector.load %arg5[%c18_129, %c0_130, %c0_131] : memref<27x2x3xf32, #tpu.memory_space<vmem>>, vector<1x2x3xf32>
    %112 = vector.shape_cast %111 : vector<1x2x3xf32> to vector<2x3xf32>
    %cst_132 = arith.constant dense<0.000000e+00> : vector<32x3xf32>
    %113 = tpu.matmul %110, %112, %cst_132 {dimension_numbers = #tpu.dot_dimension_numbers<[1], [0], [0], [1], [0, 0, 1, 1], [], []>} : vector<32x2xf32>, vector<2x3xf32>, vector<32x3xf32> -> vector<32x3xf32>
    %114 = arith.addf %108, %113 : vector<32x3xf32>
    %c0_133 = arith.constant 0 : index
    %c0_134 = arith.constant 0 : index
    %c1_135 = arith.constant 1 : index
    %c0_136 = arith.constant 0 : index
    %115 = vector.load %arg4[%c0_133, %c0_134, %c1_135, %c0_136] : memref<1x1x56x2xf32, #tpu.memory_space<vmem>>, vector<1x1x32x2xf32>
    %116 = vector.shape_cast %115 : vector<1x1x32x2xf32> to vector<32x2xf32>
    %c19 = arith.constant 19 : index
    %c0_137 = arith.constant 0 : index
    %c0_138 = arith.constant 0 : index
    %117 = vector.load %arg5[%c19, %c0_137, %c0_138] : memref<27x2x3xf32, #tpu.memory_space<vmem>>, vector<1x2x3xf32>
    %118 = vector.shape_cast %117 : vector<1x2x3xf32> to vector<2x3xf32>
    %cst_139 = arith.constant dense<0.000000e+00> : vector<32x3xf32>
    %119 = tpu.matmul %116, %118, %cst_139 {dimension_numbers = #tpu.dot_dimension_numbers<[1], [0], [0], [1], [0, 0, 1, 1], [], []>} : vector<32x2xf32>, vector<2x3xf32>, vector<32x3xf32> -> vector<32x3xf32>
    %120 = arith.addf %114, %119 : vector<32x3xf32>
    %c0_140 = arith.constant 0 : index
    %c0_141 = arith.constant 0 : index
    %c2_142 = arith.constant 2 : index
    %c0_143 = arith.constant 0 : index
    %121 = vector.load %arg4[%c0_140, %c0_141, %c2_142, %c0_143] : memref<1x1x56x2xf32, #tpu.memory_space<vmem>>, vector<1x1x32x2xf32>
    %122 = vector.shape_cast %121 : vector<1x1x32x2xf32> to vector<32x2xf32>
    %c20 = arith.constant 20 : index
    %c0_144 = arith.constant 0 : index
    %c0_145 = arith.constant 0 : index
    %123 = vector.load %arg5[%c20, %c0_144, %c0_145] : memref<27x2x3xf32, #tpu.memory_space<vmem>>, vector<1x2x3xf32>
    %124 = vector.shape_cast %123 : vector<1x2x3xf32> to vector<2x3xf32>
    %cst_146 = arith.constant dense<0.000000e+00> : vector<32x3xf32>
    %125 = tpu.matmul %122, %124, %cst_146 {dimension_numbers = #tpu.dot_dimension_numbers<[1], [0], [0], [1], [0, 0, 1, 1], [], []>} : vector<32x2xf32>, vector<2x3xf32>, vector<32x3xf32> -> vector<32x3xf32>
    %126 = arith.addf %120, %125 : vector<32x3xf32>
    %c0_147 = arith.constant 0 : index
    %c0_148 = arith.constant 0 : index
    %c8_149 = arith.constant 8 : index
    %c0_150 = arith.constant 0 : index
    %127 = vector.load %arg4[%c0_147, %c0_148, %c8_149, %c0_150] : memref<1x1x56x2xf32, #tpu.memory_space<vmem>>, vector<1x1x32x2xf32>
    %128 = vector.shape_cast %127 : vector<1x1x32x2xf32> to vector<32x2xf32>
    %c21 = arith.constant 21 : index
    %c0_151 = arith.constant 0 : index
    %c0_152 = arith.constant 0 : index
    %129 = vector.load %arg5[%c21, %c0_151, %c0_152] : memref<27x2x3xf32, #tpu.memory_space<vmem>>, vector<1x2x3xf32>
    %130 = vector.shape_cast %129 : vector<1x2x3xf32> to vector<2x3xf32>
    %cst_153 = arith.constant dense<0.000000e+00> : vector<32x3xf32>
    %131 = tpu.matmul %128, %130, %cst_153 {dimension_numbers = #tpu.dot_dimension_numbers<[1], [0], [0], [1], [0, 0, 1, 1], [], []>} : vector<32x2xf32>, vector<2x3xf32>, vector<32x3xf32> -> vector<32x3xf32>
    %132 = arith.addf %126, %131 : vector<32x3xf32>
    %c0_154 = arith.constant 0 : index
    %c0_155 = arith.constant 0 : index
    %c9_156 = arith.constant 9 : index
    %c0_157 = arith.constant 0 : index
    %133 = vector.load %arg4[%c0_154, %c0_155, %c9_156, %c0_157] : memref<1x1x56x2xf32, #tpu.memory_space<vmem>>, vector<1x1x32x2xf32>
    %134 = vector.shape_cast %133 : vector<1x1x32x2xf32> to vector<32x2xf32>
    %c22 = arith.constant 22 : index
    %c0_158 = arith.constant 0 : index
    %c0_159 = arith.constant 0 : index
    %135 = vector.load %arg5[%c22, %c0_158, %c0_159] : memref<27x2x3xf32, #tpu.memory_space<vmem>>, vector<1x2x3xf32>
    %136 = vector.shape_cast %135 : vector<1x2x3xf32> to vector<2x3xf32>
    %cst_160 = arith.constant dense<0.000000e+00> : vector<32x3xf32>
    %137 = tpu.matmul %134, %136, %cst_160 {dimension_numbers = #tpu.dot_dimension_numbers<[1], [0], [0], [1], [0, 0, 1, 1], [], []>} : vector<32x2xf32>, vector<2x3xf32>, vector<32x3xf32> -> vector<32x3xf32>
    %138 = arith.addf %132, %137 : vector<32x3xf32>
    %c0_161 = arith.constant 0 : index
    %c0_162 = arith.constant 0 : index
    %c10_163 = arith.constant 10 : index
    %c0_164 = arith.constant 0 : index
    %139 = vector.load %arg4[%c0_161, %c0_162, %c10_163, %c0_164] : memref<1x1x56x2xf32, #tpu.memory_space<vmem>>, vector<1x1x32x2xf32>
    %140 = vector.shape_cast %139 : vector<1x1x32x2xf32> to vector<32x2xf32>
    %c23 = arith.constant 23 : index
    %c0_165 = arith.constant 0 : index
    %c0_166 = arith.constant 0 : index
    %141 = vector.load %arg5[%c23, %c0_165, %c0_166] : memref<27x2x3xf32, #tpu.memory_space<vmem>>, vector<1x2x3xf32>
    %142 = vector.shape_cast %141 : vector<1x2x3xf32> to vector<2x3xf32>
    %cst_167 = arith.constant dense<0.000000e+00> : vector<32x3xf32>
    %143 = tpu.matmul %140, %142, %cst_167 {dimension_numbers = #tpu.dot_dimension_numbers<[1], [0], [0], [1], [0, 0, 1, 1], [], []>} : vector<32x2xf32>, vector<2x3xf32>, vector<32x3xf32> -> vector<32x3xf32>
    %144 = arith.addf %138, %143 : vector<32x3xf32>
    %c0_168 = arith.constant 0 : index
    %c0_169 = arith.constant 0 : index
    %c16_170 = arith.constant 16 : index
    %c0_171 = arith.constant 0 : index
    %145 = vector.load %arg4[%c0_168, %c0_169, %c16_170, %c0_171] : memref<1x1x56x2xf32, #tpu.memory_space<vmem>>, vector<1x1x32x2xf32>
    %146 = vector.shape_cast %145 : vector<1x1x32x2xf32> to vector<32x2xf32>
    %c24 = arith.constant 24 : index
    %c0_172 = arith.constant 0 : index
    %c0_173 = arith.constant 0 : index
    %147 = vector.load %arg5[%c24, %c0_172, %c0_173] : memref<27x2x3xf32, #tpu.memory_space<vmem>>, vector<1x2x3xf32>
    %148 = vector.shape_cast %147 : vector<1x2x3xf32> to vector<2x3xf32>
    %cst_174 = arith.constant dense<0.000000e+00> : vector<32x3xf32>
    %149 = tpu.matmul %146, %148, %cst_174 {dimension_numbers = #tpu.dot_dimension_numbers<[1], [0], [0], [1], [0, 0, 1, 1], [], []>} : vector<32x2xf32>, vector<2x3xf32>, vector<32x3xf32> -> vector<32x3xf32>
    %150 = arith.addf %144, %149 : vector<32x3xf32>
    %c0_175 = arith.constant 0 : index
    %c0_176 = arith.constant 0 : index
    %c17_177 = arith.constant 17 : index
    %c0_178 = arith.constant 0 : index
    %151 = vector.load %arg4[%c0_175, %c0_176, %c17_177, %c0_178] : memref<1x1x56x2xf32, #tpu.memory_space<vmem>>, vector<1x1x32x2xf32>
    %152 = vector.shape_cast %151 : vector<1x1x32x2xf32> to vector<32x2xf32>
    %c25 = arith.constant 25 : index
    %c0_179 = arith.constant 0 : index
    %c0_180 = arith.constant 0 : index
    %153 = vector.load %arg5[%c25, %c0_179, %c0_180] : memref<27x2x3xf32, #tpu.memory_space<vmem>>, vector<1x2x3xf32>
    %154 = vector.shape_cast %153 : vector<1x2x3xf32> to vector<2x3xf32>
    %cst_181 = arith.constant dense<0.000000e+00> : vector<32x3xf32>
    %155 = tpu.matmul %152, %154, %cst_181 {dimension_numbers = #tpu.dot_dimension_numbers<[1], [0], [0], [1], [0, 0, 1, 1], [], []>} : vector<32x2xf32>, vector<2x3xf32>, vector<32x3xf32> -> vector<32x3xf32>
    %156 = arith.addf %150, %155 : vector<32x3xf32>
    %c0_182 = arith.constant 0 : index
    %c0_183 = arith.constant 0 : index
    %c18_184 = arith.constant 18 : index
    %c0_185 = arith.constant 0 : index
    %157 = vector.load %arg4[%c0_182, %c0_183, %c18_184, %c0_185] : memref<1x1x56x2xf32, #tpu.memory_space<vmem>>, vector<1x1x32x2xf32>
    %158 = vector.shape_cast %157 : vector<1x1x32x2xf32> to vector<32x2xf32>
    %c26 = arith.constant 26 : index
    %c0_186 = arith.constant 0 : index
    %c0_187 = arith.constant 0 : index
    %159 = vector.load %arg5[%c26, %c0_186, %c0_187] : memref<27x2x3xf32, #tpu.memory_space<vmem>>, vector<1x2x3xf32>
    %160 = vector.shape_cast %159 : vector<1x2x3xf32> to vector<2x3xf32>
    %cst_188 = arith.constant dense<0.000000e+00> : vector<32x3xf32>
    %161 = tpu.matmul %158, %160, %cst_188 {dimension_numbers = #tpu.dot_dimension_numbers<[1], [0], [0], [1], [0, 0, 1, 1], [], []>} : vector<32x2xf32>, vector<2x3xf32>, vector<32x3xf32> -> vector<32x3xf32>
    %162 = arith.addf %156, %161 : vector<32x3xf32>
    %c0_189 = arith.constant 0 : index
    %c0_190 = arith.constant 0 : index
    %163 = vector.load %arg6[%c0_189, %c0_190] : memref<1x3xf32, #tpu.memory_space<vmem>>, vector<1x3xf32>
    %164 = vector.broadcast %163 : vector<1x3xf32> to vector<32x3xf32>
    %165 = arith.addf %162, %164 : vector<32x3xf32>
    %cst_191 = arith.constant 0.000000e+00 : f32
    %166 = vector.broadcast %cst_191 : f32 to vector<32x3xf32>
    %167 = arith.cmpf oge, %165, %166 : vector<32x3xf32>
    %cst_192 = arith.constant 0.00999999977 : f32
    %168 = vector.broadcast %cst_192 : f32 to vector<32x3xf32>
    %169 = arith.mulf %168, %165 : vector<32x3xf32>
    %170 = arith.select %167, %165, %169 : vector<32x3xi1>, vector<32x3xf32>
    %c0_193 = arith.constant 0 : index
    %c0_194 = arith.constant 0 : index
    %c0_195 = arith.constant 0 : index
    %c0_196 = arith.constant 0 : index
    %171 = vector.load %arg7[%c0_193, %c0_194, %c0_195, %c0_196] : memref<1x1x32x3xf32, #tpu.memory_space<vmem>>, vector<1x1x32x3xf32>
    %172 = vector.shape_cast %171 : vector<1x1x32x3xf32> to vector<32x3xf32>
    %173 = vector.shape_cast %170 : vector<32x3xf32> to vector<1x1x32x3xf32>
    tpu.vector_store %arg7[%c0_193, %c0_194, %c0_195, %c0_196], %173 {strides = array<i32>} : memref<1x1x32x3xf32, #tpu.memory_space<vmem>>, vector<1x1x32x3xf32>,
    return
  }
  func.func @transform_0(%arg0: i32, %arg1: i32) -> (i32, i32, i32, i32) {
    %c0_i32 = arith.constant 0 : i32
    %c0_i32_0 = arith.constant 0 : i32
    %c0_i32_1 = arith.constant 0 : i32
    return %arg0, %arg1, %c0_i32, %c0_i32_0 : i32, i32, i32, i32
  }
  func.func @transform_1(%arg0: i32, %arg1: i32) -> (i32, i32, i32, i32) {
    %c1_i32 = arith.constant 1 : i32
    %0 = arith.addi %arg1, %c1_i32 : i32
    %c0_i32 = arith.constant 0 : i32
    %c0_i32_0 = arith.constant 0 : i32
    %c0_i32_1 = arith.constant 0 : i32
    return %arg0, %0, %c0_i32, %c0_i32_0 : i32, i32, i32, i32
  }
  func.func @transform_2(%arg0: i32, %arg1: i32) -> (i32, i32, i32, i32) {
    %c2_i32 = arith.constant 2 : i32
    %0 = arith.addi %arg1, %c2_i32 : i32
    %c0_i32 = arith.constant 0 : i32
    %c0_i32_0 = arith.constant 0 : i32
    %c0_i32_1 = arith.constant 0 : i32
    return %arg0, %0, %c0_i32, %c0_i32_0 : i32, i32, i32, i32
  }
  func.func @transform_3(%arg0: i32, %arg1: i32) -> (i32, i32, i32) {
    %c0_i32 = arith.constant 0 : i32
    %c0_i32_0 = arith.constant 0 : i32
    %c0_i32_1 = arith.constant 0 : i32
    %c0_i32_2 = arith.constant 0 : i32
    return %c0_i32, %c0_i32_0, %c0_i32_1 : i32, i32, i32
  }
  func.func @transform_4(%arg0: i32, %arg1: i32) -> (i32, i32) {
    %c0_i32 = arith.constant 0 : i32
    %c0_i32_0 = arith.constant 0 : i32
    %c0_i32_1 = arith.constant 0 : i32
    return %c0_i32, %c0_i32_0 : i32, i32
  }
  func.func @transform_5(%arg0: i32, %arg1: i32) -> (i32, i32, i32, i32) {
    %c0_i32 = arith.constant 0 : i32
    %c0_i32_0 = arith.constant 0 : i32
    %c0_i32_1 = arith.constant 0 : i32
    return %arg0, %arg1, %c0_i32, %c0_i32_0 : i32, i32, i32, i32
  }
}

</mosaic_0001>

<bundles_post_ra>
// kernel: tpu_custom_call.1
= control target key start
LH: loop header
LB: loop body
LE: loop exit
PB: predicated region body
PF: predicated region fallthrough
CT: control target
= control target key end

     0   :  { %s4181_s18 = smov 0   ;;  %s4183_s19 = smov 0   ;;  %s4656_s0 = inlined_call_operand.vmem [shape: f32[1,5,56,2], index: 0, kind: input, shape index: {}]   ;;  %s4657_s1 = inlined_call_operand.vmem [shape: f32[1,5,56,2], index: 1, kind: input, shape index: {}]   ;;  %s4658_s2 = inlined_call_operand.vmem [shape: f32[1,5,56,2], index: 2, kind: input, shape index: {}]   ;;  %s4659_s3 = inlined_call_operand.vmem [shape: f32[27,2,3], index: 3, kind: input, shape index: {}]   ;;  %s4660_s4 = inlined_call_operand.vmem [shape: f32[1,3], index: 4, kind: input, shape index: {}]   ;;  %s4661_s5 = inlined_call_operand.vmem [shape: f32[1,3,32,3], index: 5, kind: output, shape index: {}]  }
   0x1   :  { %s4185_s20 = smov 0  }
   0x2 LB: > { %s24_s21 = sadd.s32 1, %s4145_s19  ;;  %p3472_p0 = scmp.ge.s32.totalorder %s4149_s20, 1  ;;  %s4149_s20 = sphi %s4185_s20, %s15_s20   ;;  %s4145_s19 = sphi %s4183_s19, %s4663_s19   ;;  %s4141_s18 = sphi %s4181_s18, %s4662_s18  }
   0x3   : > { %p25_p1 = scmp.ge.s32.totalorder %s24_s21, 3  ;;  %p247_p2 = scmp.lt.s32.totalorder %s4149_s20, 4 }
   0x5   : > { %s4665_s21 = smov (%p25_p1, %s24_s21), 0  ;;  %p248_p3 = pnand %p3472_p0, %p247_p2 }
   0x6   : > { %v3478_v0 = vld [vmem:[%s4659_s3 + $0x2] sm:$0x3] (!%p248_p3)  ;;  %vm367_vm0 = vcmask (!%p248_p3), 1041408   ;;  %v4207_v1 = vld [vmem:[%s4659_s3 + $0x1a] sm:$0x3] (!%p248_p3)  ;;  %p305_p4 = scmp.lt.s32.totalorder (!%p248_p3), %s4141_s18, 4 }
   0x7   : > { %251 = sbr.rel (%p248_p3) target bundleno = 352 (0x160), region = 40  ;;  %3778 = vmatprep.subr.msk.mxu1 (!%p248_p3), %vm367_vm0, %v3478_v0  ;;  %3882 = vmatprep.subr.msk.mxu0 (!%p248_p3), %vm367_vm0, %v4207_v1  ;;  %v347_v2 = vld [vmem:[%s4659_s3] sm:$0x3] (!%p248_p3)  ;;  %s312_s28 = sadd.s32 (!%p248_p3), 1, %s4141_s18  ;;  %v3561_v3 = vld [vmem:[%s4659_s3 + $0x1c] sm:$0x3] (!%p248_p3) }
   0x8   : > { %3779 = vmatpush3.msk.msra.mxu1 (!%p248_p3), %vm367_vm0, %v3478_v0  ;;  %3883 = vmatpush3.msk.msra.mxu0 (!%p248_p3), %vm367_vm0, %v4207_v1  ;;  %p315_p5 = scmp.lt.s32.totalorder (!%p248_p3), %s312_s28, 4  ;;  %vm354_vm1 = vcmask (!%p248_p3), 15360   ;;  %v3489_v7 = vld [vmem:[%s4659_s3 + $0x4] sm:$0x3] (!%p248_p3)  ;;  %v3567_v13 = vld [vmem:[%s4659_s3 + $0x1e] sm:$0x3] (!%p248_p3) }
   0x9   : > { %3786 = vmatprep.subr.msk.mxu1 (!%p248_p3), %vm367_vm0, %v347_v2  ;;  %3890 = vmatprep.subr.msk.mxu0 (!%p248_p3), %vm367_vm0, %v3561_v3  ;;  %v3495_v16 = vld [vmem:[%s4659_s3 + $0x6] sm:$0x3] (!%p248_p3)  ;;  %v3573_v21 = vld [vmem:[%s4659_s3 + $0x20] sm:$0x3] (!%p248_p3)  ;;  %v3501_v26 = vld [vmem:[%s4659_s3 + $0x8] sm:$0x3] (!%p248_p3) }
   0xa   : > { %v3579_v30 = vld [vmem:[%s4659_s3 + $0x22] sm:$0x3] (!%p248_p3)  ;;  %v3507_v32 = vld [vmem:[%s4659_s3 + $0xa] sm:$0x3] (!%p248_p3)  ;;  %v3585_v36 = vld [vmem:[%s4659_s3 + $0x24] sm:$0x3] (!%p248_p3) }
   0xb   : > { %v3513_v38 = vld [vmem:[%s4659_s3 + $0xc] sm:$0x3] (!%p248_p3)  ;;  %v3591_v40 = vld [vmem:[%s4659_s3 + $0x26] sm:$0x3] (!%p248_p3)  ;;  %v3519_v43 = vld [vmem:[%s4659_s3 + $0xe] sm:$0x3] (!%p248_p3) }
   0xc   : > { %v3597_v47 = vld [vmem:[%s4659_s3 + $0x28] sm:$0x3] (!%p248_p3)  ;;  %v3525_v50 = vld [vmem:[%s4659_s3 + $0x10] sm:$0x3] (!%p248_p3)  ;;  %v3603_v54 = vld [vmem:[%s4659_s3 + $0x2a] sm:$0x3] (!%p248_p3) }
   0xd   : > { %v3531_v57 = vld [vmem:[%s4659_s3 + $0x12] sm:$0x3] (!%p248_p3)  ;;  %v3609_v61 = vld [vmem:[%s4659_s3 + $0x2c] sm:$0x3] (!%p248_p3)  ;;  %v3537_v63 = vld [vmem:[%s4659_s3 + $0x14] sm:$0x3] (!%p248_p3) }
   0xe   : > { %s306_s6 = scalar_select %p305_p4, %s4141_s18, 4  ;;  %vm3329_vm3 = vcmask 23552  }
   0xf   : > { %s4667_s28 = smov (!%p315_p5, %s312_s28), 4  ;;  %p336_p7 = scmp.lt.s32.totalorder %s4141_s18, 2 }
  0x10   : > { %s4100_s7 = smul.u32 56, %s306_s6  ;;  %s323_s6 = sadd.s32 2, %s4141_s18 }
  0x11   : > { %s4101_s11 = smul.u32 56, %s4667_s28  ;;  %p326_p6 = scmp.lt.s32.totalorder %s323_s6, 4 }
  0x12   : > { %s4229_s10 = scalar_lea.vmem %s4656_s0, %s4100_s7  ;;  %s4671_s18 = smov (!%p336_p7, %s4141_s18), 2 }
  0x13   : > { %v348_v4 = vld [vmem:[%s4229_s10 + $0x1] sm:$0xff]  ;;  %v4233_v5 = vld [vmem:[%s4229_s10 + $0x9] sm:$0xff]  ;;  %v4236_v6 = vld [vmem:[%s4229_s10 + $0x11] sm:$0xff]  ;;  %s4247_s16 = scalar_lea.vmem %s4657_s1, %s4101_s11  ;;  %s4669_s6 = smov (!%p326_p6, %s323_s6), 4 }
  0x14   : > { %3780 = vmatprep.mubr.msk.f32.mxu1 %vm354_vm1, %v348_v4  ;;  %v4250_v8 = vld [vmem:[%s4247_s16 + $0x9] sm:$0xff]  ;;  %v4254_v9 = vld [vmem:[%s4247_s16 + $0x11] sm:$0xff]  ;;  %v4259_v10 = vld [vmem:[%s4229_s10 + $0x19] sm:$0xff]  ;;  %s4102_s12 = smul.u32 56, %s4669_s6  ;;  %s3642_s8 = sshll.u32 %s4671_s18, 5 }
  0x15   : > { %3781 = vmatmul.mubr.msk.f32.vlgmr.msra.gmra.mrb[0].mxu1 %vm354_vm1, %v4233_v5  ;;  %3884 = vmatprep.mubr.msk.f32.mxu0 %vm354_vm1, %v4250_v8  ;;  %v343_v11 = vld [vmem:[%s4229_s10] sm:$0xff]  ;;  %v4266_v12 = vld [vmem:[%s4247_s16 + $0xa] sm:$0xff]  ;;  %v4289_v17 = vld [vmem:[%s4247_s16 + $0x12] sm:$0xff]  ;;  %s342_s11 = scalar_lea.vmem %s4661_s5, %s3642_s8 }
  0x16   : > { %3787 = vmatpush3.msk.msra.mxu1 %vm367_vm0, %v347_v2  ;;  %3783 = vmatprep.mubr.msk.f32.mxu1 %vm354_vm1, %v4236_v6  ;;  %v344_v14 = vld [vmem:[%s4229_s10 + $0x8] sm:$0xff]  ;;  %v4282_v15 = vld [vmem:[%s4229_s10 + $0x10] sm:$0xff]  ;;  %v4295_v18 = vld [vmem:[%s4229_s10 + $0x18] sm:$0xff]  ;;  %s4404_s22 = scalar_lea.vmem %s4658_s2, %s4102_s12 }
  0x17   : > { %3794 = vmatprep.subr.msk.mxu1 %vm367_vm0, %v3489_v7  ;;  %3885 = vmatmul.mubr.msk.f32.vlgmr.msra.gmra.mrb[0].mxu0 %vm354_vm1, %v4254_v9  ;;  %v4298_v19 = vld [vmem:[%s4247_s16 + $0x1a] sm:$0xff]  ;;  %v556_v20 = vld [vmem:[%s4229_s10 + $0x2] sm:$0xff]  ;;  %v557_v23 = vld [vmem:[%s4229_s10 + $0xa] sm:$0xff] }
  0x18   : > { %3891 = vmatpush3.msk.msra.mxu0 %vm367_vm0, %v3561_v3  ;;  %3892 = vmatprep.mubr.msk.f32.mxu0 %vm354_vm1, %v4266_v12  ;;  %v1879_v22 = vld [vmem:[%s4247_s16 + $0x22] sm:$0xff]  ;;  %v4316_v24 = vld [vmem:[%s4247_s16 + $0x10] sm:$0xff]  ;;  %v4330_v27 = vld [vmem:[%s4247_s16 + $0x18] sm:$0xff] }
  0x19   : > { %3784 = vmatmul.mubr.msk.f32.gmra.mrb[2].mxu1 %vm354_vm1, %v4259_v10  ;;  %3898 = vmatprep.subr.msk.mxu0 %vm367_vm0, %v3567_v13  ;;  %v4320_v25 = vld [vmem:[%s4229_s10 + $0x12] sm:$0xff]  ;;  %v4336_v28 = vld [vmem:[%s4229_s10 + $0x1a] sm:$0xff]  ;;  %v1989_v31 = vld [vmem:[%s4247_s16 + $0x28] sm:$0xff] }
  0x1a   : > { %3788 = vmatprep.mubr.msk.f32.mxu1 %vm354_vm1, %v343_v11  ;;  %v4339_v29 = vld [vmem:[%s4247_s16 + $0x20] sm:$0xff]  ;;  %v2099_v37 = vld [vmem:[%s4247_s16 + $0x29] sm:$0xff]  ;;  %v4441_v48 = vld [vmem:[%s4404_s22 + $0x18] sm:$0xff] }
  0x1b   : > { %v4365_v33 = vld [vmem:[%s4247_s16 + $0x19] sm:$0xff]  ;;  %v4372_v35 = vld [vmem:[%s4247_s16 + $0x21] sm:$0xff]  ;;  %v2209_v41 = vld [vmem:[%s4247_s16 + $0x2a] sm:$0xff] }
  0x1c   : > { %v669_v34 = vld [vmem:[%s4229_s10 + $0x20] sm:$0xff]  ;;  %v2317_v44 = vld [vmem:[%s4404_s22 + $0x8] sm:$0xff]  ;;  %v4431_v46 = vld [vmem:[%s4404_s22 + $0x10] sm:$0xff] }
  0x1d   : > { %3789 = vmatmul.mubr.msk.f32.vlgmr.msra.gmra.mrb[0].mxu1 %vm354_vm1, %v344_v14  ;;  %v779_v39 = vld [vmem:[%s4229_s10 + $0x21] sm:$0xff]  ;;  %v2427_v51 = vld [vmem:[%s4404_s22 + $0x9] sm:$0xff]  ;;  %v4462_v53 = vld [vmem:[%s4404_s22 + $0x11] sm:$0xff] }
  0x1e   : > { %3795 = vmatpush3.msk.msra.mxu1 %vm367_vm0, %v3489_v7  ;;  %3791 = vmatprep.mubr.msk.f32.mxu1 %vm354_vm1, %v4282_v15  ;;  %v2316_v42 = vld [vmem:[%s4404_s22] sm:$0xff]  ;;  %v999_v52 = vld [vmem:[%s4229_s10 + $0x28] sm:$0xff]  ;;  %v4493_v60 = vld [vmem:[%s4404_s22 + $0x12] sm:$0xff] }
  0x1f   : > { %3802 = vmatprep.subr.msk.mxu1 %vm367_vm0, %v3495_v16  ;;  %3893 = vmatmul.mubr.msk.f32.vlgmr.msra.gmra.mrb[0].mxu0 %vm354_vm1, %v4289_v17  ;;  %v889_v45 = vld [vmem:[%s4229_s10 + $0x22] sm:$0xff]  ;;  %v4472_v55 = vld [vmem:[%s4404_s22 + $0x19] sm:$0xff]  ;;  %v2537_v58 = vld [vmem:[%s4404_s22 + $0xa] sm:$0xff] }
  0x20   : > { %3899 = vmatpush3.msk.msra.mxu0 %vm367_vm0, %v3567_v13  ;;  %3895 = vmatprep.mubr.msk.f32.mxu0 %vm354_vm1, %v4298_v19  ;;  %v2426_v49 = vld [vmem:[%s4404_s22 + $0x1] sm:$0xff]  ;;  %v1109_v59 = vld [vmem:[%s4229_s10 + $0x29] sm:$0xff]  ;;  %v3549_v13 = vld [vmem:[%s4659_s3 + $0x18] sm:$0x3] }
  0x21   : > { %3792 = vmatmul.mubr.msk.f32.gmra.mrb[2].mxu1 %vm354_vm1, %v4295_v18  ;;  %3906 = vmatprep.subr.msk.mxu0 %vm367_vm0, %v3573_v21  ;;  %v2536_v56 = vld [vmem:[%s4404_s22 + $0x2] sm:$0xff]  ;;  %v4503_v62 = vld [vmem:[%s4404_s22 + $0x1a] sm:$0xff]  ;;  %v1219_v0 = vld [vmem:[%s4229_s10 + $0x2a] sm:$0xff] }
  0x22   : > { %3796 = vmatprep.mubr.msk.f32.mxu1 %vm354_vm1, %v556_v20  ;;  %v1326_v2 = vld [vmem:[%s4247_s16] sm:$0xff]  ;;  %v3615_v3 = vld [vmem:[%s4659_s3 + $0x2e] sm:$0x3] }
  0x23   : > { %3896 = vmatmul.mubr.msk.f32.gmra.mrb[2].mxu0 %vm354_vm1, %v1879_v22  ;;  %v2649_v4 = vld [vmem:[%s4404_s22 + $0x20] sm:$0xff] }
  0x24   : > { %3900 = vmatprep.mubr.msk.f32.mxu0 %vm354_vm1, %v4316_v24  ;;  %v1436_v7 = vld [vmem:[%s4247_s16 + $0x1] sm:$0xff]  ;;  %v3639_v20 = vld [vmem:[%s4660_s4] ss:$0 sm:$0xff] }
  0x25   : > { %3797 = vmatmul.mubr.msk.f32.vlgmr.msra.gmra.mrb[0].mxu1 %vm354_vm1, %v557_v23  ;;  %v2759_v11 = vld [vmem:[%s4404_s22 + $0x21] sm:$0xff] }
  0x26   : > { %3803 = vmatpush3.msk.msra.mxu1 %vm367_vm0, %v3495_v16  ;;  %3799 = vmatprep.mubr.msk.f32.mxu1 %vm354_vm1, %v4320_v25  ;;  %v3089_v16 = vld [vmem:[%s4404_s22 + $0x29] sm:$0xff] }
  0x27   : > { %3810 = vmatprep.subr.msk.mxu1 %vm367_vm0, %v3501_v26  ;;  %3901 = vmatmul.mubr.msk.f32.vlgmr.msra.gmra.mrb[0].mxu0 %vm354_vm1, %v4330_v27 }
  0x28   : > { %3907 = vmatpush3.msk.msra.mxu0 %vm367_vm0, %v3573_v21  ;;  %3903 = vmatprep.mubr.msk.f32.mxu0 %vm354_vm1, %v4339_v29 }
  0x29   : > { %3800 = vmatmul.mubr.msk.f32.gmra.mrb[2].mxu1 %vm354_vm1, %v4336_v28  ;;  %3914 = vmatprep.subr.msk.mxu0 %vm367_vm0, %v3579_v30 }
  0x2a   : > { %3804 = vmatprep.mubr.msk.f32.mxu1 %vm354_vm1, %v344_v14  ;;  %v1546_v14 = vld [vmem:[%s4247_s16 + $0x2] sm:$0xff] }
  0x2b   : > { %3904 = vmatmul.mubr.msk.f32.gmra.mrb[2].mxu0 %vm354_vm1, %v1989_v31 }
  0x2c   : > { %3908 = vmatprep.mubr.msk.f32.mxu0 %vm354_vm1, %v4254_v9 }
  0x2d   : > { %3805 = vmatmul.mubr.msk.f32.vlgmr.msra.gmra.mrb[0].mxu1 %vm354_vm1, %v4282_v15 }
  0x2e   : > { %3811 = vmatpush3.msk.msra.mxu1 %vm367_vm0, %v3501_v26  ;;  %3807 = vmatprep.mubr.msk.f32.mxu1 %vm354_vm1, %v4295_v18 }
  0x2f   : > { %3818 = vmatprep.subr.msk.mxu1 %vm367_vm0, %v3507_v32  ;;  %3909 = vmatmul.mubr.msk.f32.vlgmr.msra.gmra.mrb[0].mxu0 %vm354_vm1, %v4365_v33 }
  0x30   : > { %3915 = vmatpush3.msk.msra.mxu0 %vm367_vm0, %v3579_v30  ;;  %3911 = vmatprep.mubr.msk.f32.mxu0 %vm354_vm1, %v4372_v35 }
  0x31   : > { %3808 = vmatmul.mubr.msk.f32.gmra.mrb[2].mxu1 %vm354_vm1, %v669_v34  ;;  %3922 = vmatprep.subr.msk.mxu0 %vm367_vm0, %v3585_v36 }
  0x32   : > { %3812 = vmatprep.mubr.msk.f32.mxu1 %vm354_vm1, %v4233_v5  ;;  %v1327_v5 = vld [vmem:[%s4247_s16 + $0x8] sm:$0xff] }
  0x33   : > { %3912 = vmatmul.mubr.msk.f32.gmra.mrb[2].mxu0 %vm354_vm1, %v2099_v37 }
  0x34   : > { %3916 = vmatprep.mubr.msk.f32.mxu0 %vm354_vm1, %v4289_v17 }
  0x35   : > { %3813 = vmatmul.mubr.msk.f32.vlgmr.msra.gmra.mrb[0].mxu1 %vm354_vm1, %v4236_v6 }
  0x36   : > { %3819 = vmatpush3.msk.msra.mxu1 %vm367_vm0, %v3507_v32  ;;  %3815 = vmatprep.mubr.msk.f32.mxu1 %vm354_vm1, %v4259_v10 }
  0x37   : > { %3826 = vmatprep.subr.msk.mxu1 %vm367_vm0, %v3513_v38  ;;  %3917 = vmatmul.mubr.msk.f32.vlgmr.msra.gmra.mrb[0].mxu0 %vm354_vm1, %v4298_v19 }
  0x38   : > { %3923 = vmatpush3.msk.msra.mxu0 %vm367_vm0, %v3585_v36  ;;  %3919 = vmatprep.mubr.msk.f32.mxu0 %vm354_vm1, %v1879_v22 }
  0x39   : > { %3816 = vmatmul.mubr.msk.f32.gmra.mrb[2].mxu1 %vm354_vm1, %v779_v39  ;;  %3930 = vmatprep.subr.msk.mxu0 %vm367_vm0, %v3591_v40 }
  0x3a   : > { %3820 = vmatprep.mubr.msk.f32.mxu1 %vm354_vm1, %v557_v23 }
  0x3b   : > { %3920 = vmatmul.mubr.msk.f32.gmra.mrb[2].mxu0 %vm354_vm1, %v2209_v41 }
  0x3c   : > { %3924 = vmatprep.mubr.msk.f32.mxu0 %vm354_vm1, %v2316_v42 }
  0x3d   : > { %3821 = vmatmul.mubr.msk.f32.vlgmr.msra.gmra.mrb[0].mxu1 %vm354_vm1, %v4320_v25 }
  0x3e   : > { %3827 = vmatpush3.msk.msra.mxu1 %vm367_vm0, %v3513_v38  ;;  %3823 = vmatprep.mubr.msk.f32.mxu1 %vm354_vm1, %v4336_v28 }
  0x3f   : > { %3834 = vmatprep.subr.msk.mxu1 %vm367_vm0, %v3519_v43  ;;  %3925 = vmatmul.mubr.msk.f32.vlgmr.msra.gmra.mrb[0].mxu0 %vm354_vm1, %v2317_v44 }
  0x40   : > { %3931 = vmatpush3.msk.msra.mxu0 %vm367_vm0, %v3591_v40  ;;  %3927 = vmatprep.mubr.msk.f32.mxu0 %vm354_vm1, %v4431_v46 }
  0x41   : > { %3824 = vmatmul.mubr.msk.f32.gmra.mrb[2].mxu1 %vm354_vm1, %v889_v45  ;;  %3938 = vmatprep.subr.msk.mxu0 %vm367_vm0, %v3597_v47 }
  0x42   : > { %3828 = vmatprep.mubr.msk.f32.mxu1 %vm354_vm1, %v4282_v15  ;;  %v3627_v15 = vld [vmem:[%s4659_s3 + $0x32] sm:$0x3] }
  0x43   : > { %3928 = vmatmul.mubr.msk.f32.gmra.mrb[2].mxu0 %vm354_vm1, %v4441_v48 }
  0x44   : > { %3932 = vmatprep.mubr.msk.f32.mxu0 %vm354_vm1, %v2426_v49 }
  0x45   : > { %3829 = vmatmul.mubr.msk.f32.vlgmr.msra.gmra.mrb[0].mxu1 %vm354_vm1, %v4295_v18 }
  0x46   : > { %3835 = vmatpush3.msk.msra.mxu1 %vm367_vm0, %v3519_v43  ;;  %3831 = vmatprep.mubr.msk.f32.mxu1 %vm354_vm1, %v669_v34 }
  0x47   : > { %3842 = vmatprep.subr.msk.mxu1 %vm367_vm0, %v3525_v50  ;;  %3933 = vmatmul.mubr.msk.f32.vlgmr.msra.gmra.mrb[0].mxu0 %vm354_vm1, %v2427_v51 }
  0x48   : > { %3939 = vmatpush3.msk.msra.mxu0 %vm367_vm0, %v3597_v47  ;;  %3935 = vmatprep.mubr.msk.f32.mxu0 %vm354_vm1, %v4462_v53 }
  0x49   : > { %3832 = vmatmul.mubr.msk.f32.gmra.mrb[2].mxu1 %vm354_vm1, %v999_v52  ;;  %3946 = vmatprep.subr.msk.mxu0 %vm367_vm0, %v3603_v54 }
  0x4a   : > { %3836 = vmatprep.mubr.msk.f32.mxu1 %vm354_vm1, %v4236_v6  ;;  %v3543_v6 = vld [vmem:[%s4659_s3 + $0x16] sm:$0x3] }
  0x4b   : > { %3936 = vmatmul.mubr.msk.f32.gmra.mrb[2].mxu0 %vm354_vm1, %v4472_v55 }
  0x4c   : > { %3940 = vmatprep.mubr.msk.f32.mxu0 %vm354_vm1, %v2536_v56 }
  0x4d   : > { %3837 = vmatmul.mubr.msk.f32.vlgmr.msra.gmra.mrb[0].mxu1 %vm354_vm1, %v4259_v10  ;;  %v3621_v10 = vld [vmem:[%s4659_s3 + $0x30] sm:$0x3] }
  0x4e   : > { %3843 = vmatpush3.msk.msra.mxu1 %vm367_vm0, %v3525_v50  ;;  %3839 = vmatprep.mubr.msk.f32.mxu1 %vm354_vm1, %v779_v39 }
  0x4f   : > { %3850 = vmatprep.subr.msk.mxu1 %vm367_vm0, %v3531_v57  ;;  %3941 = vmatmul.mubr.msk.f32.vlgmr.msra.gmra.mrb[0].mxu0 %vm354_vm1, %v2537_v58 }
  0x50   : > { %3947 = vmatpush3.msk.msra.mxu0 %vm367_vm0, %v3603_v54  ;;  %3943 = vmatprep.mubr.msk.f32.mxu0 %vm354_vm1, %v4493_v60 }
  0x51   : > { %3840 = vmatmul.mubr.msk.f32.gmra.mrb[2].mxu1 %vm354_vm1, %v1109_v59  ;;  %3954 = vmatprep.subr.msk.mxu0 %vm367_vm0, %v3609_v61 }
  0x52   : > { %3844 = vmatprep.mubr.msk.f32.mxu1 %vm354_vm1, %v4320_v25 }
  0x53   : > { %3944 = vmatmul.mubr.msk.f32.gmra.mrb[2].mxu0 %vm354_vm1, %v4503_v62 }
  0x54   : > { %3948 = vmatprep.mubr.msk.f32.mxu0 %vm354_vm1, %v2317_v44 }
  0x55   : > { %3845 = vmatmul.mubr.msk.f32.vlgmr.msra.gmra.mrb[0].mxu1 %vm354_vm1, %v4336_v28 }
  0x56   : > { %3851 = vmatpush3.msk.msra.mxu1 %vm367_vm0, %v3531_v57  ;;  %3847 = vmatprep.mubr.msk.f32.mxu1 %vm354_vm1, %v889_v45 }
  0x57   : > { %3858 = vmatprep.subr.msk.mxu1 %vm367_vm0, %v3537_v63  ;;  %3949 = vmatmul.mubr.msk.f32.vlgmr.msra.gmra.mrb[0].mxu0 %vm354_vm1, %v4431_v46 }
  0x58   : > { %3955 = vmatpush3.msk.msra.mxu0 %vm367_vm0, %v3609_v61  ;;  %3951 = vmatprep.mubr.msk.f32.mxu0 %vm354_vm1, %v4441_v48 }
  0x59   : > { %3848 = vmatmul.mubr.msk.f32.gmra.mrb[2].mxu1 %vm354_vm1, %v1219_v0  ;;  %3962 = vmatprep.subr.msk.mxu0 %vm367_vm0, %v3615_v3 }
  0x5a   : > { %3852 = vmatprep.mubr.msk.f32.mxu1 %vm354_vm1, %v1326_v2 }
  0x5b   : > { %3952 = vmatmul.mubr.msk.f32.gmra.mrb[2].mxu0 %vm354_vm1, %v2649_v4 }
  0x5c   : > { %3956 = vmatprep.mubr.msk.f32.mxu0 %vm354_vm1, %v2427_v51 }
  0x5d   : > { %3853 = vmatmul.mubr.msk.f32.vlgmr.msra.gmra.mrb[0].mxu1 %vm354_vm1, %v1327_v5 }
  0x5e   : > { %3859 = vmatpush3.msk.msra.mxu1 %vm367_vm0, %v3537_v63  ;;  %3855 = vmatprep.mubr.msk.f32.mxu1 %vm354_vm1, %v4316_v24 }
  0x5f   : > { %3866 = vmatprep.subr.msk.mxu1 %vm367_vm0, %v3543_v6  ;;  %3957 = vmatmul.mubr.msk.f32.vlgmr.msra.gmra.mrb[0].mxu0 %vm354_vm1, %v4462_v53 }
  0x60   : > { %3963 = vmatpush3.msk.msra.mxu0 %vm367_vm0, %v3615_v3  ;;  %3959 = vmatprep.mubr.msk.f32.mxu0 %vm354_vm1, %v4472_v55 }
  0x61   : > { %3856 = vmatmul.mubr.msk.f32.gmra.mrb[2].mxu1 %vm354_vm1, %v4330_v27  ;;  %3970 = vmatprep.subr.msk.mxu0 %vm367_vm0, %v3621_v10 }
  0x62   : > { %3860 = vmatprep.mubr.msk.f32.mxu1 %vm354_vm1, %v1436_v7 }
  0x63   : > { %3960 = vmatmul.mubr.msk.f32.gmra.mrb[2].mxu0 %vm354_vm1, %v2759_v11 }
  0x64   : > { %3964 = vmatprep.mubr.msk.f32.mxu0 %vm354_vm1, %v2537_v58 }
  0x65   : > { %3861 = vmatmul.mubr.msk.f32.vlgmr.msra.gmra.mrb[0].mxu1 %vm354_vm1, %v4250_v8  ;;  %v2869_v8 = vld [vmem:[%s4404_s22 + $0x22] sm:$0xff] }
  0x66   : > { %3867 = vmatpush3.msk.msra.mxu1 %vm367_vm0, %v3543_v6  ;;  %3863 = vmatprep.mubr.msk.f32.mxu1 %vm354_vm1, %v4254_v9  ;;  %v3633_v9 = vld [vmem:[%s4659_s3 + $0x34] sm:$0x3] }
  0x67   : > { %3874 = vmatprep.subr.msk.mxu1 %vm367_vm0, %v3549_v13  ;;  %3965 = vmatmul.mubr.msk.f32.vlgmr.msra.gmra.mrb[0].mxu0 %vm354_vm1, %v4493_v60 }
  0x68   : > { %3971 = vmatpush3.msk.msra.mxu0 %vm367_vm0, %v3621_v10  ;;  %3967 = vmatprep.mubr.msk.f32.mxu0 %vm354_vm1, %v4503_v62 }
  0x69   : > { %3864 = vmatmul.mubr.msk.f32.gmra.mrb[2].mxu1 %vm354_vm1, %v4365_v33  ;;  %3978 = vmatprep.subr.msk.mxu0 %vm367_vm0, %v3627_v15 }
  0x6a   : > { %3868 = vmatprep.mubr.msk.f32.mxu1 %vm354_vm1, %v1546_v14 }
  0x6b   : > { %3968 = vmatmul.mubr.msk.f32.gmra.mrb[2].mxu0 %vm354_vm1, %v2869_v8 }
  0x6c   : > { %3972 = vmatprep.mubr.msk.f32.mxu0 %vm354_vm1, %v4431_v46 }
  0x6d   : > { %3869 = vmatmul.mubr.msk.f32.vlgmr.msra.gmra.mrb[0].mxu1 %vm354_vm1, %v4266_v12  ;;  %v2979_v12 = vld [vmem:[%s4404_s22 + $0x28] sm:$0xff] }
  0x6e   : > { %3875 = vmatpush3.msk.msra.mxu1 %vm367_vm0, %v3549_v13  ;;  %3871 = vmatprep.mubr.msk.f32.mxu1 %vm354_vm1, %v4289_v17 }
  0x6f   : > { %3994 = vmatprep.subr.msk.mxu1 %vm367_vm0, %v4207_v1  ;;  %3973 = vmatmul.mubr.msk.f32.vlgmr.msra.gmra.mrb[0].mxu0 %vm354_vm1, %v4441_v48 }
  0x70   : > { %3979 = vmatpush3.msk.msra.mxu0 %vm367_vm0, %v3627_v15  ;;  %3975 = vmatprep.mubr.msk.f32.mxu0 %vm354_vm1, %v2649_v4 }
  0x71   : > { %3872 = vmatmul.mubr.msk.f32.gmra.mrb[2].mxu1 %vm354_vm1, %v4298_v19  ;;  %3986 = vmatprep.subr.msk.mxu0 %vm367_vm0, %v3633_v9 }
  0x72   : > { %3876 = vmatprep.mubr.msk.f32.mxu1 %vm354_vm1, %v1327_v5 }
  0x73   : > { %3976 = vmatmul.mubr.msk.f32.gmra.mrb[2].mxu0 %vm354_vm1, %v2979_v12 }
  0x74   : > { %3980 = vmatprep.mubr.msk.f32.mxu0 %vm354_vm1, %v4462_v53 }
  0x75   : > { %3877 = vmatmul.mubr.msk.f32.vlgmr.msra.gmra.mrb[0].mxu1 %vm354_vm1, %v4316_v24 }
  0x76   : > { %3995 = vmatpush3.msk.msra.mxu1 %vm367_vm0, %v4207_v1  ;;  %3879 = vmatprep.mubr.msk.f32.mxu1 %vm354_vm1, %v4330_v27  ;;  %v3199_v1 = vld [vmem:[%s4404_s22 + $0x2a] sm:$0xff] }
  0x77   : > { %3981 = vmatmul.mubr.msk.f32.vlgmr.msra.gmra.mrb[0].mxu0 %vm354_vm1, %v4472_v55 }
  0x78   : > { %3987 = vmatpush3.msk.msra.mxu0 %vm367_vm0, %v3633_v9  ;;  %3983 = vmatprep.mubr.msk.f32.mxu0 %vm354_vm1, %v2759_v11 }
  0x79   : > { %3880 = vmatmul.mubr.msk.f32.gmra.mrb[2].mxu1 %vm354_vm1, %v4339_v29 }
  0x7a   : > { %3887 = vmatprep.mubr.msk.f32.mxu1 %vm354_vm1, %v4365_v33 }
  0x7b   : > { %3984 = vmatmul.mubr.msk.f32.gmra.mrb[2].mxu0 %vm354_vm1, %v3089_v16 }
  0x7c   : > { %3988 = vmatprep.mubr.msk.f32.mxu0 %vm354_vm1, %v4493_v60 }
  0x7f   : > { %3989 = vmatmul.mubr.msk.f32.vlgmr.msra.gmra.mrb[0].mxu0 %vm354_vm1, %v4503_v62 }
  0x80   : > { %3991 = vmatprep.mubr.msk.f32.mxu0 %vm354_vm1, %v2869_v8 }
  0x81   : > { %3888 = vmatmul.mubr.msk.f32.vlgmr.msra.gmra.mrb[2].mxu1 %vm354_vm1, %v4372_v35 }
  0x83   : > { %3992 = vmatmul.mubr.msk.f32.gmra.mrb[2].mxu0 %vm354_vm1, %v3199_v1 }
 0x148   : > { %v3878_v17 = vpop.f32.mrb[0].mxu1 }
 0x149   : > { %v1743_v18 = vpop.f32.mrb[1].mxu1 }
 0x152   : > { %v3990_v19 = vpop.f32.mrb[0].mxu0 }
 0x153   : > { %v3996_v21 = vadd.f32 %v3990_v19, %v3878_v17  ;;  %v3283_v22 = vpop.f32.mrb[1].mxu0 }
 0x154   : > { %v3889_v23 = vpop.f32.mrb[2].mxu1  ;;  %v3997_v24 = vadd.f32 %v3283_v22, %v1743_v18 }
 0x155   : > { %v1863_v25 = vpop.f32.mrb[3].mxu1  ;;  %v3314_v26 = vadd.f32 %v3996_v21, %v3639_v20 }
 0x156   : > { %v3313_v27 = vadd.f32 %v3997_v24, %v3639_v20  ;;  %v3993_v28 = vpop.f32.mrb[2].mxu0 }
 0x157   : > { %vm3318_vm2 = vcmp.ge.f32.partialorder %v3314_v26, 0.0  ;;  %v3322_v29 = vmul.f32 0.01, %v3314_v26  ;;  %v3998_v30 = vadd.f32 %v3993_v28, %v3889_v23  ;;  %v3293_v31 = vpop.f32.mrb[3].mxu0 }
 0x158   : > { %vm3317_vm4 = vcmp.ge.f32.partialorder %v3313_v27, 0.0  ;;  %v3321_v32 = vmul.f32 0.01, %v3313_v27  ;;  %v3999_v33 = vadd.f32 %v3293_v31, %v1863_v25 }
 0x159   : > { %v3326_v34 = vsel %vm3318_vm2, %v3314_v26, %v3322_v29  ;;  %v3316_v35 = vadd.f32 %v3998_v30, %v3639_v20 }
 0x15a   : > { %3331 = vst.msk [vmem:[%s342_s11 + $0x8] sm:$0xff] %vm3329_vm3, %v3326_v34  ;;  %v3325_v36 = vsel %vm3317_vm4, %v3313_v27, %v3321_v32  ;;  %v3315_v37 = vadd.f32 %v3999_v33, %v3639_v20 }
 0x15b   : > { %3330 = vst.msk [vmem:[%s342_s11] sm:$0xff] %vm3329_vm3, %v3325_v36  ;;  %vm3320_vm5 = vcmp.ge.f32.partialorder %v3316_v35, 0.0  ;;  %v3324_v38 = vmul.f32 0.01, %v3316_v35 }
 0x15c   : > { %vm3319_vm6 = vcmp.ge.f32.partialorder %v3315_v37, 0.0  ;;  %v3323_v39 = vmul.f32 0.01, %v3315_v37 }
 0x15d   : > { %v3328_v40 = vsel %vm3320_vm5, %v3316_v35, %v3324_v38 }
 0x15e   : > { %3333 = vst.msk [vmem:[%s342_s11 + $0x18] sm:$0xff] %vm3329_vm3, %v3328_v40  ;;  %v3327_v41 = vsel %vm3319_vm6, %v3315_v37, %v3323_v39 }
 0x15f   : > { %3332 = vst.msk [vmem:[%s342_s11 + $0x10] sm:$0xff] %vm3329_vm3, %v3327_v41 }
 0x160 PF: > { %s15_s20 = sadd.s32 1, %s4149_s20   ;;  %s4662_s18 = smov %s4145_s19 }
 0x161   : > { %p12_p8 = scmp.ge.s32.totalorder %s15_s20, 5   ;;  %s4663_s19 = smov %s4665_s21 }
 0x163   :  { %14 = sbr.rel (!%p12_p8) target bundleno = 2 (0x2), region = 102 }

</bundles_post_ra>
